<compile_context>
chip_gen: v6e
topology: v6e:2x2x1
jax: 0.10.0
libtpu: 0.0.40
codegen_flags: <defaults>
</compile_context>

<pallas_src>
import functools

import jax
import jax.numpy as jnp
from jax.experimental import pallas as pl
from jax.experimental.pallas import tpu as pltpu


def _round_up(x, m):
    return (x + m - 1) // m * m


def _pad_lane(d):
    # Lane-dense last dim. Align to 256 (v6e/v7x MXU is 256 wide) once the
    # dimension exceeds a single 128-lane tile; keep 128 for tiny dims.
    return 128 if d <= 128 else _round_up(d, 256)


def _vmem_bytes(tm, th, cp, mm_bytes, out_bytes):
    """Estimated VMEM footprint: double-buffered tiles + resident accumulator."""
    dbuf = 2
    x_b = dbuf * tm * cp * mm_bytes         # x row tile (bf16)
    w1_b = dbuf * cp * th * mm_bytes        # W1 column tile
    w2_b = dbuf * th * cp * mm_bytes        # W2 row tile
    b1_b = dbuf * 8 * th * 4                # (1, th) pads sublanes to 8
    b2_b = dbuf * 8 * cp * 4
    o_b = dbuf * tm * cp * out_bytes        # output tile
    acc_b = tm * cp * 4                     # f32 accumulator scratch
    return x_b + w1_b + w2_b + b1_b + b2_b + o_b + acc_b


def _ffn_kernel(x_ref, w1_ref, b1_ref, w2_ref, b2_ref, o_ref, acc_ref):
    # Grid = (row tiles, hidden tiles).  Per invocation:
    #   x_ref:  (tm, Cp)   bf16 row tile (resident across the H axis)
    #   w1_ref: (Cp, th)   bf16 W1 column tile
    #   b1_ref: (1, th)    f32 bias-1 slice for this H tile
    #   w2_ref: (th, Cp)   bf16 W2 row tile
    #   b2_ref: (1, Cp)    f32 bias-2 (resident)
    #   o_ref:  (tm, Cp)   output tile (written on last H step)
    #   acc_ref:(tm, Cp)   f32 accumulator scratch
    h_idx = pl.program_id(1)

    # First matmul on the MXU with f32 accumulation; bias on the VPU in f32.
    h = jnp.dot(x_ref[...], w1_ref[...], preferred_element_type=jnp.float32)
    # Cast to bf16 BEFORE the ReLU: relu commutes with the monotone cast and
    # the bf16 VPU path is 2x f32 on v6e/v7x.
    h = jnp.maximum((h + b1_ref[...]).astype(w2_ref.dtype), 0)

    # Second matmul: this hidden tile's partial contribution.
    partial = jnp.dot(h, w2_ref[...], preferred_element_type=jnp.float32)

    # Write-on-first-step instead of zero-init + '+=' (saves one full
    # (tm, Cp) f32 store + load per row tile; relieves v5e's single vst slot).
    @pl.when(h_idx == 0)
    def _():
        acc_ref[...] = partial

    @pl.when(h_idx > 0)
    def _():
        acc_ref[...] += partial

    @pl.when(h_idx == pl.num_programs(1) - 1)
    def _():
        o_ref[...] = (acc_ref[...] + b2_ref[...]).astype(o_ref.dtype)


def prepare_params(w1, b1, w2, b2, matmul_dtype=jnp.bfloat16):
    """One-time pad + cast of the weights to the kernel's padded bf16 layout.

    Call this ONCE (outside the per-step forward) so each forward call only
    pads/casts the activations, not the weights.
    Zero padding is exact: padded x columns hit zero W1 rows, padded hidden
    units have zero bias (relu(0)=0) and zero W2 rows, padded output columns
    are sliced off in the forward wrapper.
    """
    C, H = w1.shape
    Cp = _pad_lane(C)
    Hp = _round_up(H, 256)
    w1p = jnp.pad(w1, ((0, Cp - C), (0, Hp - H))).astype(matmul_dtype)
    w2p = jnp.pad(w2, ((0, Hp - H), (0, Cp - C))).astype(matmul_dtype)
    b1p = jnp.pad(b1.reshape(1, H), ((0, 0), (0, Hp - H))).astype(jnp.float32)
    b2p = jnp.pad(b2.reshape(1, C), ((0, 0), (0, Cp - C))).astype(jnp.float32)
    return w1p, b1p, w2p, b2p


@functools.partial(jax.jit, static_argnames=("block_rows", "block_hidden"))
def feednets_forward(x, w1p, b1p, w2p, b2p, *, block_rows=512, block_hidden=1024):
    """x: [B, T, C]; padded/cast weights from `prepare_params`.  Returns [B, T, C]."""
    B, T, C = x.shape
    M = B * T
    Cp, Hp = w1p.shape
    mm_dtype = w1p.dtype
    out_dtype = x.dtype  # consumers that accept bf16 could set this to bf16
    assert Cp == _pad_lane(C), "params were prepared for a different embed_size"

    mm_b = jnp.dtype(mm_dtype).itemsize
    out_b = jnp.dtype(out_dtype).itemsize

    # ---- Row tile (defensively rounded: multiple of 256, or 8 for tiny M) ----
    tm = min(_round_up(block_rows, 256), _round_up(M, 8))
    tm = _round_up(tm, 8)

    # ---- Hidden (reduction) tile: multiple of 256 dividing Hp, VMEM-budgeted --
    # 28 MiB budget keeps double-buffered tiles comfortably inside v7x's 64 MiB
    # physical (32 MiB default scoped) VMEM while being irrelevant on v5e/v6e.
    vmem_budget = 28 * 1024 * 1024
    th_desired = min(_round_up(block_hidden, 256), Hp)
    cands = [t for t in range(256, Hp + 1, 256) if Hp % t == 0 and t <= th_desired]
    cands = sorted(cands, reverse=True) or [min(256, Hp)]
    th = next(
        (t for t in cands if _vmem_bytes(tm, t, Cp, mm_b, out_b) <= vmem_budget),
        cands[-1],
    )
    # If even the smallest hidden tile busts the budget, shrink the row tile.
    while _vmem_bytes(tm, th, Cp, mm_b, out_b) > vmem_budget and tm > 256:
        tm = max(256, tm - 256)
    Mp = _round_up(M, tm)

    vmem_limit = min(
        max(_vmem_bytes(tm, th, Cp, mm_b, out_b) + 8 * 1024 * 1024, 32 * 1024 * 1024),
        60 * 1024 * 1024,
    )

    # ---- Per-call activation pad + cast (weights were prepared once) --------
    x2d = jnp.pad(x.reshape(M, C), ((0, Mp - M), (0, Cp - C))).astype(mm_dtype)

    out2d = pl.pallas_call(
        _ffn_kernel,
        out_shape=jax.ShapeDtypeStruct((Mp, Cp), out_dtype),
        grid_spec=pltpu.PrefetchScalarGridSpec(
            num_scalar_prefetch=0,
            grid=(Mp // tm, Hp // th),
            in_specs=[
                pl.BlockSpec((tm, Cp), lambda i, h: (i, 0)),  # x rows (resident over H)
                pl.BlockSpec((Cp, th), lambda i, h: (0, h)),  # W1 column tile
                pl.BlockSpec((1, th), lambda i, h: (0, h)),   # b1 slice
                pl.BlockSpec((th, Cp), lambda i, h: (h, 0)),  # W2 row tile
                pl.BlockSpec((1, Cp), lambda i, h: (0, 0)),   # b2 (resident)
            ],
            out_specs=pl.BlockSpec((tm, Cp), lambda i, h: (i, 0)),
            scratch_shapes=[pltpu.VMEM((tm, Cp), jnp.float32)],
        ),
        compiler_params=pltpu.CompilerParams(
            dimension_semantics=("parallel", "arbitrary"),
            vmem_limit_bytes=int(vmem_limit),
        ),
    )(x2d, w1p, b1p, w2p, b2p)

    return out2d[:M, :C].reshape(B, T, C)


def init_params(key, embed_size, dtype=jnp.float32):
    """Deterministic init mimicking nn.Linear defaults (uniform +/- 1/sqrt(fan_in))."""
    hidden = 4 * embed_size
    k1, k2, k3, k4 = jax.random.split(key, 4)
    lim1 = 1.0 / jnp.sqrt(embed_size)
    lim2 = 1.0 / jnp.sqrt(hidden)
    w1 = jax.random.uniform(k1, (embed_size, hidden), dtype, -lim1, lim1)
    b1 = jax.random.uniform(k2, (1, hidden), dtype, -lim1, lim1)
    w2 = jax.random.uniform(k3, (hidden, embed_size), dtype, -lim2, lim2)
    b2 = jax.random.uniform(k4, (1, embed_size), dtype, -lim2, lim2)
    return w1, b1, w2, b2


if __name__ == "__main__":
    key = jax.random.PRNGKey(0)
    k_x, k_p = jax.random.split(key)

    B, T, C = 2, 8, 32  # batch, seq, embed_size
    x = jax.random.normal(k_x, (B, T, C), dtype=jnp.float32)
    w1, b1, w2, b2 = init_params(k_p, C)

    # Pad + cast the weights ONCE (outside the per-call path).
    w1p, b1p, w2p, b2p = prepare_params(w1, b1, w2, b2)

    out = feednets_forward(x, w1p, b1p, w2p, b2p)
    out = jax.block_until_ready(out)

    # Pure-JAX f32 reference (dropout is identity in eval mode).
    ref = jnp.maximum(x.reshape(-1, C) @ w1 + b1, 0.0) @ w2 + b2
    ref = ref.reshape(B, T, C)
    assert out.shape == (B, T, C)
    # bf16 matmul operands / intermediate with f32 accumulation -> relaxed tolerance.
    assert jnp.allclose(out, ref, atol=2e-2, rtol=2e-2), (
        float(jnp.max(jnp.abs(out - ref)))
    )

    print("KERNEL_OK")
</pallas_src>

<mosaic_0001>
module attributes {stable_mosaic.version = 11 : i64} {
  func.func @_ffn_kernel(%arg0: i32, %arg1: i32, %arg2: memref<16x128xbf16, #tpu.memory_space<vmem>>, %arg3: memref<128x256xbf16, #tpu.memory_space<vmem>>, %arg4: memref<1x256xf32, #tpu.memory_space<vmem>>, %arg5: memref<256x128xbf16, #tpu.memory_space<vmem>>, %arg6: memref<1x128xf32, #tpu.memory_space<vmem>>, %arg7: memref<16x128xf32, #tpu.memory_space<vmem>>, %arg8: memref<16x128xf32, #tpu.memory_space<vmem>>) attributes {dimension_semantics = [#tpu.dimension_semantics<parallel>, #tpu.dimension_semantics<arbitrary>], iteration_bounds = array<i64: 1, 1>, scalar_prefetch = 0 : i64, scratch_operands = 1 : i64, tpu.core_type = #tpu.core_type<tc>, window_params = [{transform_indices = @transform_0, window_bounds = array<i64: 16, 128>}, {transform_indices = @transform_1, window_bounds = array<i64: 128, 256>}, {transform_indices = @transform_2, window_bounds = array<i64: 1, 256>}, {transform_indices = @transform_3, window_bounds = array<i64: 256, 128>}, {pipeline_mode = #tpu.pipeline_mode<synchronous>, transform_indices = @transform_4, window_bounds = array<i64: 1, 128>}, {transform_indices = @transform_5, window_bounds = array<i64: 16, 128>}]} {
    %c0 = arith.constant 0 : index
    %c0_0 = arith.constant 0 : index
    %0 = vector.load %arg2[%c0, %c0_0] : memref<16x128xbf16, #tpu.memory_space<vmem>>, vector<16x128xbf16>
    %c0_1 = arith.constant 0 : index
    %c0_2 = arith.constant 0 : index
    %1 = vector.load %arg3[%c0_1, %c0_2] : memref<128x256xbf16, #tpu.memory_space<vmem>>, vector<128x256xbf16>
    %cst = arith.constant dense<0.000000e+00> : vector<16x256xf32>
    %2 = tpu.matmul %0, %1, %cst {dimension_numbers = #tpu.dot_dimension_numbers<[1], [0], [0], [1], [0, 0, 1, 1], [], []>} : vector<16x128xbf16>, vector<128x256xbf16>, vector<16x256xf32> -> vector<16x256xf32>
    %c0_3 = arith.constant 0 : index
    %c0_4 = arith.constant 0 : index
    %3 = vector.load %arg4[%c0_3, %c0_4] : memref<1x256xf32, #tpu.memory_space<vmem>>, vector<1x256xf32>
    %4 = vector.broadcast %3 : vector<1x256xf32> to vector<16x256xf32>
    %5 = arith.addf %2, %4 : vector<16x256xf32>
    %6 = arith.truncf %5 : vector<16x256xf32> to vector<16x256xbf16>
    %cst_5 = arith.constant 0.000000e+00 : bf16
    %7 = vector.broadcast %cst_5 : bf16 to vector<16x256xbf16>
    %8 = arith.maximumf %6, %7 : vector<16x256xbf16>
    %c0_6 = arith.constant 0 : index
    %c0_7 = arith.constant 0 : index
    %9 = vector.load %arg5[%c0_6, %c0_7] : memref<256x128xbf16, #tpu.memory_space<vmem>>, vector<256x128xbf16>
    %cst_8 = arith.constant dense<0.000000e+00> : vector<16x128xf32>
    %10 = tpu.matmul %8, %9, %cst_8 {dimension_numbers = #tpu.dot_dimension_numbers<[1], [0], [0], [1], [0, 0, 1, 1], [], []>} : vector<16x256xbf16>, vector<256x128xbf16>, vector<16x128xf32> -> vector<16x128xf32>
    %c0_i32 = arith.constant 0 : i32
    %11 = arith.cmpi eq, %arg1, %c0_i32 : i32
    %12 = arith.extui %11 : i1 to i32
    %c0_i32_9 = arith.constant 0 : i32
    %13 = arith.cmpi ne, %12, %c0_i32_9 : i32
    scf.if %13 {
      %c0_14 = arith.constant 0 : index
      %c0_15 = arith.constant 0 : index
      %20 = vector.load %arg8[%c0_14, %c0_15] : memref<16x128xf32, #tpu.memory_space<vmem>>, vector<16x128xf32>
      tpu.vector_store %arg8[%c0_14, %c0_15], %10 {strides = array<i32>} : memref<16x128xf32, #tpu.memory_space<vmem>>, vector<16x128xf32>,
    } else {
    }
    %c0_i32_10 = arith.constant 0 : i32
    %14 = arith.cmpi sgt, %arg1, %c0_i32_10 : i32
    %15 = arith.extui %14 : i1 to i32
    %c0_i32_11 = arith.constant 0 : i32
    %16 = arith.cmpi ne, %15, %c0_i32_11 : i32
    scf.if %16 {
      %c0_14 = arith.constant 0 : index
      %c0_15 = arith.constant 0 : index
      %20 = vector.load %arg8[%c0_14, %c0_15] : memref<16x128xf32, #tpu.memory_space<vmem>>, vector<16x128xf32>
      %21 = arith.addf %20, %10 : vector<16x128xf32>
      %c0_16 = arith.constant 0 : index
      %c0_17 = arith.constant 0 : index
      %22 = vector.load %arg8[%c0_16, %c0_17] : memref<16x128xf32, #tpu.memory_space<vmem>>, vector<16x128xf32>
      tpu.vector_store %arg8[%c0_16, %c0_17], %21 {strides = array<i32>} : memref<16x128xf32, #tpu.memory_space<vmem>>, vector<16x128xf32>,
    } else {
    }
    %c0_i32_12 = arith.constant 0 : i32
    %17 = arith.cmpi eq, %arg1, %c0_i32_12 : i32
    %18 = arith.extui %17 : i1 to i32
    %c0_i32_13 = arith.constant 0 : i32
    %19 = arith.cmpi ne, %18, %c0_i32_13 : i32
    scf.if %19 {
      %c0_14 = arith.constant 0 : index
      %c0_15 = arith.constant 0 : index
      %20 = vector.load %arg8[%c0_14, %c0_15] : memref<16x128xf32, #tpu.memory_space<vmem>>, vector<16x128xf32>
      %c0_16 = arith.constant 0 : index
      %c0_17 = arith.constant 0 : index
      %21 = vector.load %arg6[%c0_16, %c0_17] : memref<1x128xf32, #tpu.memory_space<vmem>>, vector<1x128xf32>
      %22 = vector.broadcast %21 : vector<1x128xf32> to vector<16x128xf32>
      %23 = arith.addf %20, %22 : vector<16x128xf32>
      %c0_18 = arith.constant 0 : index
      %c0_19 = arith.constant 0 : index
      %24 = vector.load %arg7[%c0_18, %c0_19] : memref<16x128xf32, #tpu.memory_space<vmem>>, vector<16x128xf32>
      tpu.vector_store %arg7[%c0_18, %c0_19], %23 {strides = array<i32>} : memref<16x128xf32, #tpu.memory_space<vmem>>, vector<16x128xf32>,
    } else {
    }
    return
  }
  func.func @transform_0(%arg0: i32, %arg1: i32) -> (i32, i32) {
    %c0_i32 = arith.constant 0 : i32
    %c0_i32_0 = arith.constant 0 : i32
    return %arg0, %c0_i32 : i32, i32
  }
  func.func @transform_1(%arg0: i32, %arg1: i32) -> (i32, i32) {
    %c0_i32 = arith.constant 0 : i32
    %c0_i32_0 = arith.constant 0 : i32
    return %c0_i32, %arg1 : i32, i32
  }
  func.func @transform_2(%arg0: i32, %arg1: i32) -> (i32, i32) {
    %c0_i32 = arith.constant 0 : i32
    %c0_i32_0 = arith.constant 0 : i32
    return %c0_i32, %arg1 : i32, i32
  }
  func.func @transform_3(%arg0: i32, %arg1: i32) -> (i32, i32) {
    %c0_i32 = arith.constant 0 : i32
    %c0_i32_0 = arith.constant 0 : i32
    return %arg1, %c0_i32 : i32, i32
  }
  func.func @transform_4(%arg0: i32, %arg1: i32) -> (i32, i32) {
    %c0_i32 = arith.constant 0 : i32
    %c0_i32_0 = arith.constant 0 : i32
    %c0_i32_1 = arith.constant 0 : i32
    return %c0_i32, %c0_i32_0 : i32, i32
  }
  func.func @transform_5(%arg0: i32, %arg1: i32) -> (i32, i32) {
    %c0_i32 = arith.constant 0 : i32
    %c0_i32_0 = arith.constant 0 : i32
    return %arg0, %c0_i32 : i32, i32
  }
}

</mosaic_0001>

<bundles_post_ra>
// kernel: feednets_forward.1
= control target key start
LH: loop header
LB: loop body
LE: loop exit
PB: predicated region body
PF: predicated region fallthrough
CT: control target
= control target key end

     0   :  { %10 = vsyncpa [#allocation4], 0  ;;  %s628_s0 = inlined_call_operand.vmem [shape: bf16[16,128], index: 0, kind: input, shape index: {}]   ;;  %s629_s1 = inlined_call_operand.hbm [shape: bf16[128,256], index: 1, kind: input, shape index: {}]   ;;  %s630_s2 = inlined_call_operand.vmem [shape: f32[1,256], index: 2, kind: input, shape index: {}]   ;;  %s631_s3 = inlined_call_operand.hbm [shape: bf16[256,128], index: 3, kind: input, shape index: {}]   ;;  %s632_s4 = inlined_call_operand.vmem [shape: f32[1,128], index: 4, kind: input, shape index: {}]   ;;  %s633_s5 = inlined_call_operand.vmem [shape: f32[16,128], index: 5, kind: output, shape index: {}]  }
   0x1   :  { %11 = vsyncpa [#allocation6], 0  ;;  %s567_s18 = smov [#allocation3]  }
   0x2   :  { %s19_s19 = sshll.u32 %s567_s18, 4  ;;  %s20_s19 = int_to_ptr.vmem [resolvable:$true] %s19_s19 }
   0x3   :  { %s531_s20 = scalar_lea.vmem %s20_s19, 2048  ;;  %p536_p1 = scmp.lt.s32.totalorder %s20_s19, %s20_s19 }
   0x4   :  { %p532_p0 = scmp.ne.s32.totalorder %s20_s19, %s531_s20  ;;  %p537_p2 = scmp.lt.s32.totalorder %s531_s20, %s531_s20 }
   0x6   :  { %p538_p3 = por %p537_p2, %p536_p1 }
   0x8   :  { %p539_p4 = pnand %p538_p3, %p532_p0 }
   0xa   :  { %542 = shalt.err (!%p539_p4)
}
   0xb   :  { %s568_s21 = smov 128   ;;  %s569_s22 = smov 8  }
   0xc   :  { %25 = dma.hbm_to_vmem [thread:$0]  %s629_s1, 2048, %s20_s19, [#allocation4], %s568_s21, %s568_s21, %s569_s22  }
   0xd   :  { %s570_s25 = smov [#allocation5]  }
   0xe   :  { %s33_s26 = sshll.u32 %s570_s25, 4  ;;  %s34_s26 = int_to_ptr.vmem [resolvable:$true] %s33_s26 }
   0xf   :  { %s551_s27 = scalar_lea.vmem %s34_s26, 2048  ;;  %p556_p6 = scmp.lt.s32.totalorder %s34_s26, %s34_s26 }
  0x10   :  { %p552_p5 = scmp.ne.s32.totalorder %s34_s26, %s551_s27  ;;  %p557_p7 = scmp.lt.s32.totalorder %s551_s27, %s551_s27 }
  0x12   :  { %p558_p8 = por %p557_p7, %p556_p6 }
  0x14   :  { %p559_p9 = pnand %p558_p8, %p552_p5 }
  0x16   :  { %562 = shalt.err (!%p559_p9)
}
  0x17   :  { %s571_s28 = smov 64   ;;  %s572_s29 = smov 4  }
  0x18   :  { %39 = dma.hbm_to_vmem [thread:$0]  %s631_s3, 2048, %s34_s26, [#allocation6], %s571_s28, %s571_s28, %s572_s29  }
  0x19   :  { %563 = dma.done.wait [#allocation4], 2048  }
  0x1a   :  { %564 = vsyncadd [#allocation4], 4294965248 }
  0x1b   :  { %565 = dma.done.wait [#allocation6], 2048  }
  0x1c   :  { %566 = vsyncadd [#allocation6], 4294965248  ;;  %v573_v0 = vmov 0   ;;  %v482_v1 = vld [vmem:[#allocation3 + $0x74] ss:$8 sps:$4 sm:$0xff]   ;;  %v511_v16 = vld [vmem:[#allocation5 + $0x68] sm:$0xff]   ;;  %v69_v34 = vlaneseq }
  0x1d   :  { %197 = vmatprep.mubr.bf16.mxu0 %v573_v0  ;;  %v484_v2 = vld [vmem:[#allocation3 + $0x70] ss:$8 sps:$4 sm:$0xff]   ;;  %165 = vmatprep.subr.bf16.mxu0 %v482_v1  ;;  %v485_v3 = vld [vmem:[#allocation3 + $0x64] ss:$8 sps:$4 sm:$0xff]   ;;  %v487_v4 = vld [vmem:[#allocation3 + $0x60] ss:$8 sps:$4 sm:$0xff]  }
  0x1e   :  { %166 = vmatpush1.bf16.msra.mxu0 %v484_v2  ;;  %v488_v5 = vld [vmem:[#allocation3 + $0x54] ss:$8 sps:$4 sm:$0xff]   ;;  %v490_v6 = vld [vmem:[#allocation3 + $0x50] ss:$8 sps:$4 sm:$0xff]   ;;  %v491_v7 = vld [vmem:[#allocation3 + $0x44] ss:$8 sps:$4 sm:$0xff]  }
  0x1f   :  { %167 = vmatprep.subr.bf16.mxu0 %v485_v3  ;;  %v493_v8 = vld [vmem:[#allocation3 + $0x40] ss:$8 sps:$4 sm:$0xff]   ;;  %v494_v9 = vld [vmem:[#allocation3 + $0x34] ss:$8 sps:$4 sm:$0xff]   ;;  %v496_v11 = vld [vmem:[#allocation3 + $0x30] ss:$8 sps:$4 sm:$0xff]  }
  0x20   :  { %v507_v10 = vld [vmem:[#allocation5 + $0x78] sm:$0xff]   ;;  %v497_v13 = vld [vmem:[#allocation3 + $0x24] ss:$8 sps:$4 sm:$0xff]   ;;  %v509_v14 = vld [vmem:[#allocation5 + $0x70] sm:$0xff]   ;;  %v70_v35 = vshrl.u32 %v69_v34, 7 }
  0x21   :  { %v508_v12 = vld [vmem:[#allocation5 + $0x38] sm:$0xff]   ;;  %453 = vmatprep.subr.bf16.mxu1 %v507_v10  ;;  %v510_v15 = vld [vmem:[#allocation5 + $0x30] sm:$0xff]   ;;  %v499_v17 = vld [vmem:[#allocation3 + $0x20] ss:$8 sps:$4 sm:$0xff]  }
  0x22   :  { %168 = vmatpush1.bf16.msra.mxu0 %v487_v4  ;;  %454 = vmatpush3.bf16.msra.mxu1 %v508_v12  ;;  %v500_v18 = vld [vmem:[#allocation3 + $0x14] ss:$8 sps:$4 sm:$0xff]   ;;  %v512_v19 = vld [vmem:[#allocation5 + $0x28] sm:$0xff]   ;;  %v513_v20 = vld [vmem:[#allocation5 + $0x60] sm:$0xff]   ;;  %v71_v36 = vsub.s32 0, %v70_v35  ;;  %v75_v38 = vsub.s32 1, %v70_v35 }
  0x23   :  { %169 = vmatprep.subr.bf16.mxu0 %v488_v5  ;;  %455 = vmatprep.subr.bf16.mxu1 %v509_v14  ;;  %v502_v21 = vld [vmem:[#allocation3 + $0x10] ss:$8 sps:$4 sm:$0xff]   ;;  %v514_v22 = vld [vmem:[#allocation5 + $0x20] sm:$0xff]   ;;  %v519_v30 = vld [vmem:[#allocation5 + $0x48] sm:$0xff]  }
  0x24   :  { %v503_v23 = vld [vmem:[#allocation3 + $0x4] ss:$8 sps:$4 sm:$0xff]   ;;  %v515_v24 = vld [vmem:[#allocation5 + $0x58] sm:$0xff]   ;;  %v505_v25 = vld [vmem:[#allocation3] ss:$8 sps:$4 sm:$0xff]  }
  0x25   :  { %v516_v26 = vld [vmem:[#allocation5 + $0x18] sm:$0xff]   ;;  %v506_v27 = vld [vmem:[%s628_s0] sm:$0xff]   ;;  %v517_v28 = vld [vmem:[#allocation5 + $0x50] sm:$0xff]  }
  0x26   :  { %170 = vmatpush1.bf16.msra.mxu0 %v490_v6  ;;  %456 = vmatpush3.bf16.msra.mxu1 %v510_v15  ;;  %v518_v29 = vld [vmem:[#allocation5 + $0x10] sm:$0xff]   ;;  %v520_v31 = vld [vmem:[#allocation5 + $0x8] sm:$0xff]   ;;  %v521_v32 = vld [vmem:[#allocation5 + $0x40] sm:$0xff]  }
  0x27   :  { %171 = vmatprep.subr.bf16.mxu0 %v491_v7  ;;  %457 = vmatprep.subr.bf16.mxu1 %v511_v16  ;;  %v522_v33 = vld [vmem:[#allocation5] sm:$0xff]  }
  0x28   :  { %v67_v37 = vld [vmem:[%s630_s2] sm:$0x3] }
  0x29   :  { %v72_v40 = vrot.slane %v67_v37, %v71_v36  ;;  %v76_v42 = vrot.slane %v67_v37, %v75_v38  ;;  %v452_v55 = vld [vmem:[%s632_s4] ss:$0 sm:$0xff] }
  0x2a   :  { %172 = vmatpush1.bf16.msra.mxu0 %v493_v8  ;;  %458 = vmatpush3.bf16.msra.mxu1 %v512_v19 }
  0x2b   :  { %173 = vmatprep.subr.bf16.mxu0 %v494_v9  ;;  %459 = vmatprep.subr.bf16.mxu1 %v513_v20 }
  0x2e   :  { %174 = vmatpush1.bf16.msra.mxu0 %v496_v11  ;;  %460 = vmatpush3.bf16.msra.mxu1 %v514_v22 }
  0x2f   :  { %175 = vmatprep.subr.bf16.mxu0 %v497_v13  ;;  %461 = vmatprep.subr.bf16.mxu1 %v515_v24 }
  0x32   :  { %176 = vmatpush1.bf16.msra.mxu0 %v499_v17  ;;  %462 = vmatpush3.bf16.msra.mxu1 %v516_v26 }
  0x33   :  { %177 = vmatprep.subr.bf16.mxu0 %v500_v18  ;;  %463 = vmatprep.subr.bf16.mxu1 %v517_v28 }
  0x36   :  { %178 = vmatpush1.bf16.msra.mxu0 %v502_v21  ;;  %464 = vmatpush3.bf16.msra.mxu1 %v518_v29 }
  0x37   :  { %179 = vmatprep.subr.bf16.mxu0 %v503_v23  ;;  %465 = vmatprep.subr.bf16.mxu1 %v519_v30 }
  0x3a   :  { %180 = vmatpush1.bf16.msra.mxu0 %v505_v25  ;;  %466 = vmatpush3.bf16.msra.mxu1 %v520_v31 }
  0x3b   :  { %467 = vmatprep.subr.bf16.mxu1 %v521_v32 }
  0x3d   :  { %198 = vmatmul.mubr.bf16.vlgmr.msra.gmra.mxu0 %v506_v27 }
  0x3e   :  { %468 = vmatpush3.bf16.msra.mxu1 %v522_v33 }
  0xfd   :  { %v199_v39 = vpop.f32.mrf.mxu0 }
  0xfe   :  { %v200_v45 = vadd.f32 %v199_v39, %v72_v40 }
  0xff   :  { %v201_v41 = vpop.f32.mrf.mxu0 }
 0x100   :  { %v202_v47 = vadd.f32 %v201_v41, %v76_v42 }
 0x101   :  { %v203_v43 = vpop.f32.mrf.mxu0 }
 0x102   :  { %v204_v44 = vadd.f32 %v203_v43, %v72_v40 }
 0x103   :  { %v205_v46 = vpop.f32.mrf.mxu0 }
 0x104   :  { %v206_v48 = vadd.f32 %v205_v46, %v76_v42  ;;  %v208_v49 = vpack.c.bf16 %v204_v44, %v200_v45 }
 0x106   :  { %v209_v50 = vpack.c.bf16 %v206_v48, %v202_v47  ;;  %v210_v52 = vmax.bf16 %v573_v0, %v208_v49 }
 0x108   :  { %v211_v51 = vmax.bf16 %v573_v0, %v209_v50 }
 0x10a   :  { %372 = vmatprep.mubr.bf16.mxu1 %v211_v51 }
 0x10b   :  { %373 = vmatmul.mubr.bf16.vlgmr.msra.gmra.mxu1 %v210_v52 }
 0x1cb   :  { %v469_v53 = vpop.f32.mrf.mxu1 }
 0x1cd   :  { %v470_v54 = vpop.f32.mrf.mxu1 }
 0x1ce   :  { %v471_v56 = vadd.f32 %v470_v54, %v469_v53 }
 0x1cf   :  { %v472_v57 = vpop.f32.mrf.mxu1 }
 0x1d0   :  { %v409_v58 = vadd.f32 %v471_v56, %v452_v55 }
 0x1d1   :  { %v473_v59 = vpop.f32.mrf.mxu1 }
 0x1d2   :  { %411 = vst [vmem:[%s633_s5] sm:$0xff] %v409_v58  ;;  %v474_v60 = vadd.f32 %v473_v59, %v472_v57 }
 0x1d4   :  { %v410_v61 = vadd.f32 %v474_v60, %v452_v55 }
 0x1d6   :  { %412 = vst [vmem:[%s633_s5 + $0x8] sm:$0xff] %v410_v61 }
 0x1d7   :  { %417 = vsyncpa [#allocation4], 1 }
 0x1d8   :  { %418 = vsyncpa [#allocation6], 1 }

</bundles_post_ra>
